<compile_context>
chip_gen: v5e
topology: v5e:2x2
jax: 0.10.0
libtpu: 0.0.40
codegen_flags: <defaults>
</compile_context>

<pallas_src>
import jax
import jax.numpy as jnp
from jax.experimental import pallas as pl
from jax.experimental.pallas import tpu as pltpu

# Finite "-inf" sentinel.  Safe because all aggregated messages are post-ReLU
# (>= 0); rows that received no message are mapped to 0 afterwards.
_NEG = -3.0e38


def _round_up(n, m):
    return ((n + m - 1) // m) * m


# ----------------------------------------------------------------------------
# Kernel 1: fused MLP (stack of Linear + ReLU), row-tiled.
#   grid = (rows // TR,), weights VMEM-resident (constant index_map),
#   bf16 operands into the MXU, f32 accumulation / activations.
# ----------------------------------------------------------------------------
def _make_mlp_kernel(num_layers, final_relu):
    def kernel(x_ref, *refs):
        out_ref = refs[-1]
        wb = refs[:-1]
        h = x_ref[...]                                    # bf16 [TR, Cin]
        for l in range(num_layers):
            w = wb[2 * l][...]                            # bf16
            b = wb[2 * l + 1][...]                        # f32  [1, Cout]
            h = jnp.dot(h, w, preferred_element_type=jnp.float32) + b
            if final_relu or l < num_layers - 1:
                h = jnp.maximum(h, 0.0)
            if l < num_layers - 1:
                h = h.astype(jnp.bfloat16)
        out_ref[...] = h.astype(out_ref.dtype)
    return kernel


def mlp_apply(x, params, final_relu=True, block_rows=128):
    R, Cin = x.shape
    Rp = _round_up(R, block_rows)
    xp = jnp.pad(x, ((0, Rp - R), (0, 0))).astype(jnp.bfloat16)

    args = [xp]
    in_specs = [pl.BlockSpec((block_rows, Cin), lambda r: (r, 0))]
    for w, b in params:
        args.append(w.astype(jnp.bfloat16))
        in_specs.append(pl.BlockSpec(w.shape, lambda r: (0, 0)))
        args.append(b.reshape(1, -1).astype(jnp.float32))
        in_specs.append(pl.BlockSpec((1, b.shape[0]), lambda r: (0, 0)))

    out_dim = params[-1][0].shape[1]
    out = pl.pallas_call(
        _make_mlp_kernel(len(params), final_relu),
        grid=(Rp // block_rows,),
        out_shape=jax.ShapeDtypeStruct((Rp, out_dim), jnp.float32),
        in_specs=in_specs,
        out_specs=pl.BlockSpec((block_rows, out_dim), lambda r: (r, 0)),
        compiler_params=pltpu.CompilerParams(
            dimension_semantics=("parallel",),
            vmem_limit_bytes=32 * 1024 * 1024),
    )(*args)
    return out[:R]


# ----------------------------------------------------------------------------
# Kernel 2: fused GCU (two dense EdgeConvs + trailing Linear+ReLU).
#   message(i, j) = MLP([x_i, x_j - x_i])  per branch, masked max over j,
#   out[i] = ReLU([agg_tpl | agg_geo] @ Wm + bm)
# Layer-1 is decomposed as x_i @ (W1a - W1b) + x_j @ W1b; the two branches'
# layer-1 weights are concatenated along the output dim and layer-2 weights
# are block-diagonal, so one wide MXU matmul serves both branches.
# ----------------------------------------------------------------------------
def _gcu_kernel(xi_ref, xj_ref, at_ref, ag_ref,
                w1d_ref, w1b_ref, b1_ref, w2_ref, b2_ref, wm_ref, bm_ref,
                out_ref, acc_ref):
    j = pl.program_id(1)

    @pl.when(j == 0)
    def _():
        acc_ref[...] = jnp.full_like(acc_ref, _NEG)

    # layer-1 (per-node matmuls, tiny): a_i covers x_i terms (+bias), b_j the x_j terms
    a_i = jnp.dot(xi_ref[...], w1d_ref[...],
                  preferred_element_type=jnp.float32) + b1_ref[...]        # [TI, cout]
    b_j = jnp.dot(xj_ref[...], w1b_ref[...],
                  preferred_element_type=jnp.float32)                      # [TJ, cout]
    h1 = jnp.maximum(a_i[:, None, :] + b_j[None, :, :], 0.0)               # [TI, TJ, cout] f32
    h1 = h1.astype(jnp.bfloat16)

    # layer-2: one block-diagonal matmul for both branches (MXU, f32 accum)
    ti, tj, cout = h1.shape
    h2 = jnp.dot(h1.reshape(ti * tj, cout), w2_ref[...],
                 preferred_element_type=jnp.float32)
    h2 = jnp.maximum(h2 + b2_ref[...], 0.0).reshape(ti, tj, cout)          # [TI, TJ, cout]

    # branch-dependent adjacency mask: lanes [0, half) use tpl, [half, cout) use geo
    half = cout // 2
    lane = jax.lax.broadcasted_iota(jnp.int32, (1, 1, cout), 2)
    sel = (lane < half).astype(jnp.float32)                                # [1, 1, cout]
    adj = at_ref[...][:, :, None] * sel + ag_ref[...][:, :, None] * (1.0 - sel)
    msg = jnp.where(adj > 0.0, h2, _NEG)
    acc_ref[...] = jnp.maximum(acc_ref[...], jnp.max(msg, axis=1))         # running max

    @pl.when(j == pl.num_programs(1) - 1)
    def _():
        agg = acc_ref[...]
        agg = jnp.where(agg <= _NEG * 0.5, 0.0, agg)    # isolated / padded rows -> 0
        out = jnp.dot(agg.astype(jnp.bfloat16), wm_ref[...],
                      preferred_element_type=jnp.float32) + bm_ref[...]
        out_ref[...] = jnp.maximum(out, 0.0)            # trailing GCU MLP ReLU


def _pack_gcu(gparams):
    (w1_t, b1_t), (w2_t, b2_t) = gparams["ec_tpl"]
    (w1_g, b1_g), (w2_g, b2_g) = gparams["ec_geo"]
    (wm, bm), = gparams["mlp"]
    C = w1_t.shape[0] // 2
    H = w1_t.shape[1]                                    # = cout // 2
    w1a_t, w1b_t = w1_t[:C], w1_t[C:]
    w1a_g, w1b_g = w1_g[:C], w1_g[C:]
    w1d = jnp.concatenate([w1a_t - w1b_t, w1a_g - w1b_g], axis=1)   # (C, cout)
    w1b = jnp.concatenate([w1b_t, w1b_g], axis=1)                   # (C, cout)
    b1 = jnp.concatenate([b1_t, b1_g]).reshape(1, -1)
    z = jnp.zeros((H, H), jnp.float32)
    w2 = jnp.block([[w2_t, z], [z, w2_g]])                          # (cout, cout) block-diag
    b2 = jnp.concatenate([b2_t, b2_g]).reshape(1, -1)
    return dict(w1d=w1d.astype(jnp.bfloat16), w1b=w1b.astype(jnp.bfloat16), b1=b1,
                w2=w2.astype(jnp.bfloat16), b2=b2,
                wm=wm.astype(jnp.bfloat16), bm=bm.reshape(1, -1))


def gcu_apply(x, adj_tpl, adj_geo, gparams, *, tile_j=128):
    N, C = x.shape
    packed = _pack_gcu(gparams)
    cout = packed["w2"].shape[1]
    # keep the [TI, TJ, cout] tile ~4 MiB (f32) so the kernel fits v7x's 64 MiB VMEM
    tile_i = max(8, min(128, (128 * 128 * 64) // (tile_j * cout)))

    Np = _round_up(N, 128)
    xp = jnp.pad(x, ((0, Np - N), (0, 0))).astype(jnp.bfloat16)
    atp = jnp.pad(adj_tpl, ((0, Np - N), (0, Np - N)))
    agp = jnp.pad(adj_geo, ((0, Np - N), (0, Np - N)))
    grid = (Np // tile_i, Np // tile_j)

    flops = 2 * Np * Np * cout * cout + 2 * Np * (2 * C * cout + cout * cout)
    bytes_acc = 4 * (2 * Np * Np + Np * cout) + 2 * Np * C

    out = pl.pallas_call(
        _gcu_kernel,
        grid=grid,
        out_shape=jax.ShapeDtypeStruct((Np, cout), jnp.float32),
        in_specs=[
            pl.BlockSpec((tile_i, C), lambda i, j: (i, 0)),        # x rows (dest)
            pl.BlockSpec((tile_j, C), lambda i, j: (j, 0)),        # x rows (source)
            pl.BlockSpec((tile_i, tile_j), lambda i, j: (i, j)),   # adj_tpl tile
            pl.BlockSpec((tile_i, tile_j), lambda i, j: (i, j)),   # adj_geo tile
            pl.BlockSpec(packed["w1d"].shape, lambda i, j: (0, 0)),
            pl.BlockSpec(packed["w1b"].shape, lambda i, j: (0, 0)),
            pl.BlockSpec(packed["b1"].shape, lambda i, j: (0, 0)),
            pl.BlockSpec(packed["w2"].shape, lambda i, j: (0, 0)),
            pl.BlockSpec(packed["b2"].shape, lambda i, j: (0, 0)),
            pl.BlockSpec(packed["wm"].shape, lambda i, j: (0, 0)),
            pl.BlockSpec(packed["bm"].shape, lambda i, j: (0, 0)),
        ],
        out_specs=pl.BlockSpec((tile_i, cout), lambda i, j: (i, 0)),
        scratch_shapes=[pltpu.VMEM((tile_i, cout), jnp.float32)],
        compiler_params=pltpu.CompilerParams(
            dimension_semantics=("parallel", "arbitrary"),
            vmem_limit_bytes=48 * 1024 * 1024),
        cost_estimate=pl.CostEstimate(flops=int(flops), transcendentals=0,
                                      bytes_accessed=int(bytes_acc)),
    )(xp, xp, atp, agp,
      packed["w1d"], packed["w1b"], packed["b1"],
      packed["w2"], packed["b2"], packed["wm"], packed["bm"])
    return out[:N]


# ----------------------------------------------------------------------------
# Kernel 3: scatter_max over the batch index (per-graph max pooling),
# streamed over node tiles with a [B, C] running-max accumulator.
#   seg_onehot[b, n] = 1.0 iff node n belongs to graph b.
# ----------------------------------------------------------------------------
def _segmax_kernel(x_ref, onehot_ref, out_ref, acc_ref):
    t = pl.program_id(0)

    @pl.when(t == 0)
    def _():
        acc_ref[...] = jnp.full_like(acc_ref, _NEG)

    vals = jnp.where(onehot_ref[...][:, :, None] > 0.0,
                     x_ref[...][None, :, :], _NEG)        # [B, TN, C]
    acc_ref[...] = jnp.maximum(acc_ref[...], jnp.max(vals, axis=1))

    @pl.when(t == pl.num_programs(0) - 1)
    def _():
        out_ref[...] = jnp.where(acc_ref[...] <= _NEG * 0.5, 0.0, acc_ref[...])


def segment_max(x, seg_onehot, block_rows=128):
    N, C = x.shape
    B = seg_onehot.shape[0]
    Np = _round_up(N, block_rows)
    xp = jnp.pad(x, ((0, Np - N), (0, 0)))
    mp = jnp.pad(seg_onehot, ((0, 0), (0, Np - N)))
    return pl.pallas_call(
        _segmax_kernel,
        grid=(Np // block_rows,),
        out_shape=jax.ShapeDtypeStruct((B, C), jnp.float32),
        in_specs=[pl.BlockSpec((block_rows, C), lambda t: (t, 0)),
                  pl.BlockSpec((B, block_rows), lambda t: (0, t))],
        out_specs=pl.BlockSpec((B, C), lambda t: (0, 0)),
        scratch_shapes=[pltpu.VMEM((B, C), jnp.float32)],
        compiler_params=pltpu.CompilerParams(
            dimension_semantics=("arbitrary",),
            vmem_limit_bytes=32 * 1024 * 1024),
    )(xp, mp)


# ----------------------------------------------------------------------------
# Parameter init (deterministic, in-script)
# ----------------------------------------------------------------------------
def init_mlp(key, channels):
    params = []
    for i in range(1, len(channels)):
        key, kw, kb = jax.random.split(key, 3)
        fan_in = channels[i - 1]
        w = jax.random.normal(kw, (fan_in, channels[i]), jnp.float32) / jnp.sqrt(float(fan_in))
        b = 0.01 * jax.random.normal(kb, (channels[i],), jnp.float32)
        params.append((w, b))
    return key, params


def init_params(key):
    p = {}
    key, p["expand"] = init_mlp(key, [8, 32, 64, 128, 256])       # expand_joint_feature
    key, p["mlp_j1"] = init_mlp(key, [3, 64, 64, 128])            # joint encoder (simplified)
    key, p["mlp_j2"] = init_mlp(key, [128, 256, 128])

    def init_gcu(key, cin, cout):
        g = {}
        key, g["ec_tpl"] = init_mlp(key, [cin * 2, cout // 2, cout // 2])
        key, g["ec_geo"] = init_mlp(key, [cin * 2, cout // 2, cout // 2])
        key, g["mlp"] = init_mlp(key, [cout, cout])
        return key, g

    key, p["gcu1"] = init_gcu(key, 3, 64)
    key, p["gcu2"] = init_gcu(key, 64, 128)
    key, p["gcu3"] = init_gcu(key, 128, 256)
    key, p["mlp_glb"] = init_mlp(key, [64 + 128 + 256, 256, 64])
    key, p["mix"] = init_mlp(key, [448, 128, 64, 1])              # MLP([448,128,64]) + Linear(64,1)
    return p


# ----------------------------------------------------------------------------
# Model forward (glue in plain JAX, compute in Pallas kernels)
# ----------------------------------------------------------------------------
def pair_cls_forward(params, data, permute_joints=False, key=None):
    # --- JointEncoder (simplified per its docstring; see TODO at top) ---
    j1 = mlp_apply(data["joints"], params["mlp_j1"])                    # [J, 128]
    j_glb = segment_max(j1, data["joints_onehot"])                      # [B, 128]
    joint_feature = mlp_apply(j_glb, params["mlp_j2"])                  # [B, 128]
    # repeat_interleave(feat, bincount(pairs_batch)) == feat[pairs_batch]
    # because pairs_batch is sorted (standard PyG batching).
    joint_feature = joint_feature[data["pairs_batch"]]                  # [P, 128]

    # --- ShapeEncoder (GCUs fully fused: 2x EdgeConv + Linear per pallas_call) ---
    x1 = gcu_apply(data["pos"], data["adj_tpl"], data["adj_geo"], params["gcu1"])   # [N, 64]
    x2 = gcu_apply(x1, data["adj_tpl"], data["adj_geo"], params["gcu2"])            # [N, 128]
    x3 = gcu_apply(x2, data["adj_tpl"], data["adj_geo"], params["gcu3"])            # [N, 256]
    x4 = mlp_apply(jnp.concatenate([x1, x2, x3], axis=1), params["mlp_glb"])        # [N, 64]
    shape_glb = segment_max(x4, data["batch_onehot"])                               # [B, 64]
    shape_feature = shape_glb[data["pairs_batch"]]                                  # [P, 64]

    # --- pair feature ---
    pairs = data["pairs"]
    pair_attr = data["pair_attr"]
    if permute_joints:
        perm = (jax.random.uniform(key, (pairs.shape[0],)) >= 0.5).astype(jnp.int32)
        idx0 = jnp.where(perm == 1, pairs[:, 1], pairs[:, 0])
        idx1 = jnp.where(perm == 1, pairs[:, 0], pairs[:, 1])
    else:
        idx0, idx1 = pairs[:, 0], pairs[:, 1]
    joints_pair = jnp.concatenate(
        [data["joints"][idx0], data["joints"][idx1], pair_attr[:, :-1]], axis=1)    # [P, 8]

    pair_feature = mlp_apply(joints_pair, params["expand"])                         # [P, 256]
    pair_feature = jnp.concatenate([shape_feature, joint_feature, pair_feature], axis=1)  # [P, 448]

    # mix_transform: MLP([448,128,64]) + Dropout(identity) + Linear(64,1)
    pre_label = mlp_apply(pair_feature, params["mix"], final_relu=False)            # [P, 1]
    gt_label = pair_attr[:, -1:].astype(jnp.float32)                                # [P, 1]
    return pre_label, gt_label


# ----------------------------------------------------------------------------
# Driver
# ----------------------------------------------------------------------------
if __name__ == "__main__":
    key = jax.random.PRNGKey(0)
    key, pkey = jax.random.split(key)
    params = init_params(pkey)

    B = 2    # graphs in the batch
    N = 32   # mesh vertices (16 per graph)
    J = 8    # joints (4 per graph)
    P = 12   # candidate joint pairs (6 per graph)

    key, k_pos, k_a1, k_a2, k_j, k_p0, k_p1, k_attr, k_lbl = jax.random.split(key, 9)

    pos = jax.random.normal(k_pos, (N, 3), jnp.float32)
    batch = jnp.concatenate([jnp.zeros(N // 2, jnp.int32), jnp.ones(N // 2, jnp.int32)])
    same = batch[:, None] == batch[None, :]

    def make_adj(k):
        r = jax.random.uniform(k, (N, N))
        a = (r < 0.25) & same
        a = a | a.T | jnp.eye(N, dtype=bool)
        return a.astype(jnp.float32)

    adj_tpl = make_adj(k_a1)
    adj_geo = make_adj(k_a2)

    joints = jax.random.normal(k_j, (J, 3), jnp.float32)
    joints_batch = jnp.concatenate([jnp.zeros(J // 2, jnp.int32), jnp.ones(J // 2, jnp.int32)])

    pairs0 = jax.random.randint(k_p0, (P // 2, 2), 0, J // 2)
    pairs1 = jax.random.randint(k_p1, (P // 2, 2), J // 2, J)
    pairs = jnp.concatenate([pairs0, pairs1], axis=0).astype(jnp.int32)
    pairs_batch = jnp.concatenate([jnp.zeros(P // 2, jnp.int32), jnp.ones(P // 2, jnp.int32)])

    attr = jax.random.uniform(k_attr, (P, 2), jnp.float32)
    lbl = (jax.random.uniform(k_lbl, (P, 1)) > 0.5).astype(jnp.float32)
    pair_attr = jnp.concatenate([attr, lbl], axis=1)                 # [P, 3], last col = gt label

    data = dict(
        pos=pos,
        batch_onehot=jax.nn.one_hot(batch, B, dtype=jnp.float32).T,          # [B, N]
        adj_tpl=adj_tpl,
        adj_geo=adj_geo,
        joints=joints,
        joints_onehot=jax.nn.one_hot(joints_batch, B, dtype=jnp.float32).T,  # [B, J]
        pairs=pairs,
        pairs_batch=pairs_batch,
        pair_attr=pair_attr,
    )

    pre_label, gt_label = pair_cls_forward(params, data, permute_joints=False)
    jax.block_until_ready((pre_label, gt_label))
    assert pre_label.shape == (P, 1) and gt_label.shape == (P, 1)
    assert bool(jnp.all(jnp.isfinite(pre_label)))
    print("KERNEL_OK")
</pallas_src>

<mosaic_0001>
module attributes {stable_mosaic.version = 11 : i64} {
  func.func @kernel(%arg0: i32, %arg1: memref<128x3xbf16, #tpu.memory_space<vmem>>, %arg2: memref<3x64xbf16, #tpu.memory_space<vmem>>, %arg3: memref<1x64xf32, #tpu.memory_space<vmem>>, %arg4: memref<64x64xbf16, #tpu.memory_space<vmem>>, %arg5: memref<1x64xf32, #tpu.memory_space<vmem>>, %arg6: memref<64x128xbf16, #tpu.memory_space<vmem>>, %arg7: memref<1x128xf32, #tpu.memory_space<vmem>>, %arg8: memref<128x128xf32, #tpu.memory_space<vmem>>) attributes {dimension_semantics = [#tpu.dimension_semantics<parallel>], iteration_bounds = array<i64: 1>, scalar_prefetch = 0 : i64, scratch_operands = 0 : i64, tpu.core_type = #tpu.core_type<tc>, window_params = [{transform_indices = @transform_0, window_bounds = array<i64: 128, 3>}, {pipeline_mode = #tpu.pipeline_mode<synchronous>, transform_indices = @transform_1, window_bounds = array<i64: 3, 64>}, {pipeline_mode = #tpu.pipeline_mode<synchronous>, transform_indices = @transform_2, window_bounds = array<i64: 1, 64>}, {pipeline_mode = #tpu.pipeline_mode<synchronous>, transform_indices = @transform_3, window_bounds = array<i64: 64, 64>}, {pipeline_mode = #tpu.pipeline_mode<synchronous>, transform_indices = @transform_4, window_bounds = array<i64: 1, 64>}, {pipeline_mode = #tpu.pipeline_mode<synchronous>, transform_indices = @transform_5, window_bounds = array<i64: 64, 128>}, {pipeline_mode = #tpu.pipeline_mode<synchronous>, transform_indices = @transform_6, window_bounds = array<i64: 1, 128>}, {transform_indices = @transform_7, window_bounds = array<i64: 128, 128>}]} {
    %c0 = arith.constant 0 : index
    %c0_0 = arith.constant 0 : index
    %0 = vector.load %arg1[%c0, %c0_0] : memref<128x3xbf16, #tpu.memory_space<vmem>>, vector<128x3xbf16>
    %c0_1 = arith.constant 0 : index
    %c0_2 = arith.constant 0 : index
    %1 = vector.load %arg2[%c0_1, %c0_2] : memref<3x64xbf16, #tpu.memory_space<vmem>>, vector<3x64xbf16>
    %c0_3 = arith.constant 0 : index
    %c0_4 = arith.constant 0 : index
    %2 = vector.load %arg3[%c0_3, %c0_4] : memref<1x64xf32, #tpu.memory_space<vmem>>, vector<1x64xf32>
    %cst = arith.constant dense<0.000000e+00> : vector<128x64xf32>
    %3 = tpu.matmul %0, %1, %cst {dimension_numbers = #tpu.dot_dimension_numbers<[1], [0], [0], [1], [0, 0, 1, 1], [], []>} : vector<128x3xbf16>, vector<3x64xbf16>, vector<128x64xf32> -> vector<128x64xf32>
    %4 = vector.broadcast %2 : vector<1x64xf32> to vector<128x64xf32>
    %5 = arith.addf %3, %4 : vector<128x64xf32>
    %cst_5 = arith.constant 0.000000e+00 : f32
    %6 = vector.broadcast %cst_5 : f32 to vector<128x64xf32>
    %7 = arith.maximumf %5, %6 : vector<128x64xf32>
    %8 = arith.truncf %7 : vector<128x64xf32> to vector<128x64xbf16>
    %c0_6 = arith.constant 0 : index
    %c0_7 = arith.constant 0 : index
    %9 = vector.load %arg4[%c0_6, %c0_7] : memref<64x64xbf16, #tpu.memory_space<vmem>>, vector<64x64xbf16>
    %c0_8 = arith.constant 0 : index
    %c0_9 = arith.constant 0 : index
    %10 = vector.load %arg5[%c0_8, %c0_9] : memref<1x64xf32, #tpu.memory_space<vmem>>, vector<1x64xf32>
    %cst_10 = arith.constant dense<0.000000e+00> : vector<128x64xf32>
    %11 = tpu.matmul %8, %9, %cst_10 {dimension_numbers = #tpu.dot_dimension_numbers<[1], [0], [0], [1], [0, 0, 1, 1], [], []>} : vector<128x64xbf16>, vector<64x64xbf16>, vector<128x64xf32> -> vector<128x64xf32>
    %12 = vector.broadcast %10 : vector<1x64xf32> to vector<128x64xf32>
    %13 = arith.addf %11, %12 : vector<128x64xf32>
    %cst_11 = arith.constant 0.000000e+00 : f32
    %14 = vector.broadcast %cst_11 : f32 to vector<128x64xf32>
    %15 = arith.maximumf %13, %14 : vector<128x64xf32>
    %16 = arith.truncf %15 : vector<128x64xf32> to vector<128x64xbf16>
    %c0_12 = arith.constant 0 : index
    %c0_13 = arith.constant 0 : index
    %17 = vector.load %arg6[%c0_12, %c0_13] : memref<64x128xbf16, #tpu.memory_space<vmem>>, vector<64x128xbf16>
    %c0_14 = arith.constant 0 : index
    %c0_15 = arith.constant 0 : index
    %18 = vector.load %arg7[%c0_14, %c0_15] : memref<1x128xf32, #tpu.memory_space<vmem>>, vector<1x128xf32>
    %cst_16 = arith.constant dense<0.000000e+00> : vector<128x128xf32>
    %19 = tpu.matmul %16, %17, %cst_16 {dimension_numbers = #tpu.dot_dimension_numbers<[1], [0], [0], [1], [0, 0, 1, 1], [], []>} : vector<128x64xbf16>, vector<64x128xbf16>, vector<128x128xf32> -> vector<128x128xf32>
    %20 = vector.broadcast %18 : vector<1x128xf32> to vector<128x128xf32>
    %21 = arith.addf %19, %20 : vector<128x128xf32>
    %cst_17 = arith.constant 0.000000e+00 : f32
    %22 = vector.broadcast %cst_17 : f32 to vector<128x128xf32>
    %23 = arith.maximumf %21, %22 : vector<128x128xf32>
    %c0_18 = arith.constant 0 : index
    %c0_19 = arith.constant 0 : index
    %24 = vector.load %arg8[%c0_18, %c0_19] : memref<128x128xf32, #tpu.memory_space<vmem>>, vector<128x128xf32>
    tpu.vector_store %arg8[%c0_18, %c0_19], %23 {strides = array<i32>} : memref<128x128xf32, #tpu.memory_space<vmem>>, vector<128x128xf32>,
    return
  }
  func.func @transform_0(%arg0: i32) -> (i32, i32) {
    %c0_i32 = arith.constant 0 : i32
    %c0_i32_0 = arith.constant 0 : i32
    return %arg0, %c0_i32 : i32, i32
  }
  func.func @transform_1(%arg0: i32) -> (i32, i32) {
    %c0_i32 = arith.constant 0 : i32
    %c0_i32_0 = arith.constant 0 : i32
    %c0_i32_1 = arith.constant 0 : i32
    return %c0_i32, %c0_i32_0 : i32, i32
  }
  func.func @transform_2(%arg0: i32) -> (i32, i32) {
    %c0_i32 = arith.constant 0 : i32
    %c0_i32_0 = arith.constant 0 : i32
    %c0_i32_1 = arith.constant 0 : i32
    return %c0_i32, %c0_i32_0 : i32, i32
  }
  func.func @transform_3(%arg0: i32) -> (i32, i32) {
    %c0_i32 = arith.constant 0 : i32
    %c0_i32_0 = arith.constant 0 : i32
    %c0_i32_1 = arith.constant 0 : i32
    return %c0_i32, %c0_i32_0 : i32, i32
  }
  func.func @transform_4(%arg0: i32) -> (i32, i32) {
    %c0_i32 = arith.constant 0 : i32
    %c0_i32_0 = arith.constant 0 : i32
    %c0_i32_1 = arith.constant 0 : i32
    return %c0_i32, %c0_i32_0 : i32, i32
  }
  func.func @transform_5(%arg0: i32) -> (i32, i32) {
    %c0_i32 = arith.constant 0 : i32
    %c0_i32_0 = arith.constant 0 : i32
    %c0_i32_1 = arith.constant 0 : i32
    return %c0_i32, %c0_i32_0 : i32, i32
  }
  func.func @transform_6(%arg0: i32) -> (i32, i32) {
    %c0_i32 = arith.constant 0 : i32
    %c0_i32_0 = arith.constant 0 : i32
    %c0_i32_1 = arith.constant 0 : i32
    return %c0_i32, %c0_i32_0 : i32, i32
  }
  func.func @transform_7(%arg0: i32) -> (i32, i32) {
    %c0_i32 = arith.constant 0 : i32
    %c0_i32_0 = arith.constant 0 : i32
    return %arg0, %c0_i32 : i32, i32
  }
}

</mosaic_0001>

<bundles_post_ra>
// kernel: tpu_custom_call.1
= control target key start
LH: loop header
LB: loop body
LE: loop exit
PB: predicated region body
PF: predicated region fallthrough
CT: control target
= control target key end

     0   :  { %vm114_vm0 = vcmask 1040384   ;;  %vm115_vm1 = vcmask 1041408   ;;  %v633_v1 = vmov 65535   ;;  %s800_s0 = inlined_call_operand.vmem [shape: bf16[128,3], index: 0, kind: input, shape index: {}]   ;;  %s801_s1 = inlined_call_operand.vmem [shape: bf16[3,64], index: 1, kind: input, shape index: {}]   ;;  %s802_s2 = inlined_call_operand.vmem [shape: f32[1,64], index: 2, kind: input, shape index: {}]   ;;  %s803_s3 = inlined_call_operand.vmem [shape: bf16[64,64], index: 3, kind: input, shape index: {}]   ;;  %s804_s4 = inlined_call_operand.vmem [shape: f32[1,64], index: 4, kind: input, shape index: {}]   ;;  %s805_s5 = inlined_call_operand.vmem [shape: bf16[64,128], index: 5, kind: input, shape index: {}]   ;;  %s806_s6 = inlined_call_operand.vmem [shape: f32[1,128], index: 6, kind: input, shape index: {}]   ;;  %s807_s7 = inlined_call_operand.hbm [shape: f32[128,128], index: 7, kind: output, shape index: {}]  }
   0x1   :  { %v44_v0 = vld [vmem:[%s801_s1] sm:$0x3]  ;;  %v116_v2 = vsel %vm114_vm0, 4294967295, %v633_v1 }
   0x2   :  { %v117_v3 = vsel %vm115_vm1, %v116_v2, 0 }
   0x3   :  { %v119_v4 = vand.u32 %v117_v3, %v44_v0 }
   0x4   :  { %12 = vsyncpa [#allocation3], 0  ;;  %v575_v5 = vld [vmem:[%s800_s0] sm:$0xff]  ;;  %vm89_vm2 = vcmask 23552   ;;  %v576_v6 = vld [vmem:[%s800_s0 + $0x8] sm:$0xff]  ;;  %vm230_vm3 = vcmask 523264  }
   0x5   :  { %128 = vmatpush.bf16.msra.mxu0 %v119_v4  ;;  %591 = vmatpush.bf16.msra.mxu3 %v119_v4  ;;  %v577_v7 = vld [vmem:[%s800_s0 + $0x10] sm:$0xff]  ;;  %v578_v8 = vld [vmem:[%s800_s0 + $0x18] sm:$0xff]  ;;  %v579_v9 = vld [vmem:[%s800_s0 + $0x20] sm:$0xff]  ;;  %s475_s14 = sshll.u32 %s807_s7, 4  ;;  %s635_s15 = smov 128   ;;  %s476_s14 = int_to_ptr.hbm [resolvable:$true] %s475_s14 }
   0x6   :  { %v582_v10 = vld [vmem:[%s800_s0 + $0x38] sm:$0xff]  ;;  %v580_v11 = vld [vmem:[%s800_s0 + $0x28] sm:$0xff]  ;;  %v581_v13 = vld [vmem:[%s800_s0 + $0x30] sm:$0xff]  ;;  %s636_s16 = smov 8  }
   0x7   :  { %v586_v12 = vld [vmem:[%s803_s3 + $0x18] sm:$0xff]  ;;  %v585_v14 = vld [vmem:[%s803_s3 + $0x10] sm:$0xff]  ;;  %v584_v15 = vld [vmem:[%s803_s3 + $0x8] sm:$0xff] }
   0x8   :  { %519 = vmatmul.msk.bf16.vlgmr.msra.gmra.mxu0 %vm89_vm2, %v575_v5  ;;  %526 = vmatmul.msk.bf16.vlgmr.msra.gmra.mxu3 %vm89_vm2, %v582_v10  ;;  %v583_v16 = vld [vmem:[%s803_s3] sm:$0xff]  ;;  %v590_v1 = vld [vmem:[%s805_s5 + $0x18] sm:$0xff]  ;;  %v589_v5 = vld [vmem:[%s805_s5 + $0x10] sm:$0xff] }
   0x9   :  { %259 = vmatpush.bf16.msra.mxu1 %v586_v12  ;;  %592 = vmatpush.bf16.msrb.mxu3 %v586_v12  ;;  %v727_v18 = vld [vmem:[%s802_s2] ss:$0 sm:$0xff] }
   0xa   :  { %392 = vmatpush.bf16.msra.mxu2 %v590_v1  ;;  %v587_v10 = vld [vmem:[%s805_s5] sm:$0xff] }
   0xd   :  { %260 = vmatpush.bf16.msra.mxu1 %v585_v14  ;;  %593 = vmatpush.bf16.msrb.mxu3 %v585_v14 }
   0xe   :  { %393 = vmatpush.bf16.msra.mxu2 %v589_v5 }
  0x11   :  { %261 = vmatpush.bf16.msra.mxu1 %v584_v15  ;;  %594 = vmatpush.bf16.msrb.mxu3 %v584_v15  ;;  %v605_v15 = vld [vmem:[%s804_s4] ss:$0 sm:$0xff] }
  0x15   :  { %262 = vmatpush.bf16.msra.mxu1 %v583_v16  ;;  %595 = vmatpush.bf16.msrb.mxu3 %v583_v16 }
  0x18   :  { %520 = vmatmul.msk.bf16.gmra.mxu0 %vm89_vm2, %v576_v6 }
  0x19   :  { %596 = vmatpush.bf16.msra.mxu3 %v590_v1 }
  0x1d   :  { %597 = vmatpush.bf16.msra.mxu3 %v589_v5 }
  0x28   :  { %521 = vmatmul.msk.bf16.gmra.mxu0 %vm89_vm2, %v577_v7  ;;  %v588_v7 = vld [vmem:[%s805_s5 + $0x8] sm:$0xff] }
  0x29   :  { %394 = vmatpush.bf16.msra.mxu2 %v588_v7  ;;  %598 = vmatpush.bf16.msra.mxu3 %v588_v7  ;;  %v779_v7 = vld [vmem:[%s806_s6] ss:$0 sm:$0xff]  ;;  %s634_s6 = smov [#allocation2]  }
  0x2a   :  { %s473_s11 = sshll.u32 %s634_s6, 4  ;;  %s474_s11 = int_to_ptr.vmem [resolvable:$true] %s473_s11 }
  0x2d   :  { %395 = vmatpush.bf16.msra.mxu2 %v587_v10  ;;  %599 = vmatpush.bf16.msra.mxu3 %v587_v10 }
  0x38   :  { %522 = vmatmul.msk.bf16.gmra.mxu0 %vm89_vm2, %v578_v8 }
  0x48   :  { %523 = vmatmul.msk.bf16.gmra.mxu0 %vm89_vm2, %v579_v9 }
  0x58   :  { %524 = vmatmul.msk.bf16.gmra.mxu0 %vm89_vm2, %v580_v11 }
  0x68   :  { %525 = vmatmul.msk.bf16.gmra.mxu0 %vm89_vm2, %v581_v13 }
  0x85   :  { %v130_v17 = vpop.f32.mrf.mxu0 }
  0x86   :  { %v131_v19 = vadd.f32 %v727_v18, %v130_v17 }
  0x88   :  { %v170_v22 = vmax.f32 %v131_v19, 0.0 }
  0x8b   :  { %v165_v63 = vpop.f32.mrf.mxu3 }
  0x8c   :  { %v166_v8 = vadd.f32 %v727_v18, %v165_v63 }
  0x8d   :  { %v132_v20 = vpop.f32.mrf.mxu0 }
  0x8e   :  { %v133_v21 = vadd.f32 %v727_v18, %v132_v20  ;;  %v184_v11 = vmax.f32 %v166_v8, 0.0 }
  0x90   :  { %v171_v23 = vmax.f32 %v133_v21, 0.0 }
  0x92   :  { %v186_v24 = vpack.c.bf16 %v171_v23, %v170_v22 }
  0x93   :  { %v167_v6 = vpop.f32.mrf.mxu3 }
  0x94   :  { %543 = vmatmul.msk.bf16.vlgmr.msra.gmra.mxu1 %vm230_vm3, %v186_v24  ;;  %v168_v9 = vadd.f32 %v727_v18, %v167_v6 }
  0x95   :  { %v135_v25 = vpop.f32.mrf.mxu0 }
  0x96   :  { %v136_v26 = vadd.f32 %v727_v18, %v135_v25  ;;  %v185_v12 = vmax.f32 %v168_v9, 0.0 }
  0x98   :  { %v172_v29 = vmax.f32 %v136_v26, 0.0  ;;  %v193_v13 = vpack.c.bf16 %v185_v12, %v184_v11 }
  0x9d   :  { %v137_v27 = vpop.f32.mrf.mxu0 }
  0x9e   :  { %v138_v28 = vadd.f32 %v727_v18, %v137_v27 }
  0xa0   :  { %v173_v30 = vmax.f32 %v138_v28, 0.0 }
  0xa2   :  { %v187_v31 = vpack.c.bf16 %v173_v30, %v172_v29 }
  0xa4   :  { %544 = vmatmul.msk.bf16.gmra.mxu1 %vm230_vm3, %v187_v31 }
  0xa5   :  { %v140_v32 = vpop.f32.mrf.mxu0 }
  0xa6   :  { %v141_v33 = vadd.f32 %v727_v18, %v140_v32 }
  0xa8   :  { %v174_v36 = vmax.f32 %v141_v33, 0.0 }
  0xad   :  { %v142_v34 = vpop.f32.mrf.mxu0 }
  0xae   :  { %v143_v35 = vadd.f32 %v727_v18, %v142_v34 }
  0xb0   :  { %v175_v37 = vmax.f32 %v143_v35, 0.0 }
  0xb2   :  { %v188_v38 = vpack.c.bf16 %v175_v37, %v174_v36 }
  0xb4   :  { %545 = vmatmul.msk.bf16.gmra.mxu1 %vm230_vm3, %v188_v38 }
  0xb5   :  { %v145_v39 = vpop.f32.mrf.mxu0 }
  0xb6   :  { %v146_v40 = vadd.f32 %v727_v18, %v145_v39 }
  0xb8   :  { %v176_v43 = vmax.f32 %v146_v40, 0.0 }
  0xbd   :  { %v147_v41 = vpop.f32.mrf.mxu0 }
  0xbe   :  { %v148_v42 = vadd.f32 %v727_v18, %v147_v41 }
  0xc0   :  { %v177_v44 = vmax.f32 %v148_v42, 0.0 }
  0xc2   :  { %v189_v45 = vpack.c.bf16 %v177_v44, %v176_v43 }
  0xc4   :  { %546 = vmatmul.msk.bf16.gmra.mxu1 %vm230_vm3, %v189_v45 }
  0xc5   :  { %v150_v46 = vpop.f32.mrf.mxu0 }
  0xc6   :  { %v151_v47 = vadd.f32 %v727_v18, %v150_v46 }
  0xc8   :  { %v178_v50 = vmax.f32 %v151_v47, 0.0 }
  0xcd   :  { %v152_v48 = vpop.f32.mrf.mxu0 }
  0xce   :  { %v153_v49 = vadd.f32 %v727_v18, %v152_v48 }
  0xd0   :  { %v179_v51 = vmax.f32 %v153_v49, 0.0 }
  0xd2   :  { %v190_v52 = vpack.c.bf16 %v179_v51, %v178_v50 }
  0xd4   :  { %547 = vmatmul.msk.bf16.gmra.mxu1 %vm230_vm3, %v190_v52 }
  0xd5   :  { %v155_v53 = vpop.f32.mrf.mxu0 }
  0xd6   :  { %v156_v54 = vadd.f32 %v727_v18, %v155_v53 }
  0xd8   :  { %v180_v57 = vmax.f32 %v156_v54, 0.0 }
  0xdd   :  { %v157_v55 = vpop.f32.mrf.mxu0 }
  0xde   :  { %v158_v56 = vadd.f32 %v727_v18, %v157_v55 }
  0xe0   :  { %v181_v58 = vmax.f32 %v158_v56, 0.0 }
  0xe2   :  { %v191_v59 = vpack.c.bf16 %v181_v58, %v180_v57 }
  0xe4   :  { %548 = vmatmul.msk.bf16.gmra.mxu1 %vm230_vm3, %v191_v59 }
  0xe5   :  { %v160_v60 = vpop.f32.mrf.mxu0 }
  0xe6   :  { %v161_v61 = vadd.f32 %v727_v18, %v160_v60 }
  0xe8   :  { %v182_v2 = vmax.f32 %v161_v61, 0.0 }
  0xed   :  { %v162_v62 = vpop.f32.mrf.mxu0 }
  0xee   :  { %v163_v0 = vadd.f32 %v727_v18, %v162_v62 }
  0xf0   :  { %v183_v3 = vmax.f32 %v163_v0, 0.0 }
  0xf2   :  { %v192_v4 = vpack.c.bf16 %v183_v3, %v182_v2 }
  0xf4   :  { %549 = vmatmul.msk.bf16.vlgmr.msrb.gmra.mxu3 %vm230_vm3, %v192_v4 }
 0x104   :  { %550 = vmatmul.msk.bf16.gmra.mxu3 %vm230_vm3, %v193_v13 }
 0x111   :  { %v264_v14 = vpop.f32.mrf.mxu1 }
 0x112   :  { %v265_v16 = vadd.f32 %v605_v15, %v264_v14 }
 0x114   :  { %v304_v18 = vmax.f32 %v265_v16, 0.0 }
 0x119   :  { %v266_v17 = vpop.f32.mrf.mxu1 }
 0x11a   :  { %v267_v19 = vadd.f32 %v605_v15, %v266_v17 }
 0x11c   :  { %v305_v20 = vmax.f32 %v267_v19, 0.0 }
 0x11e   :  { %v320_v21 = vpack.c.bf16 %v305_v20, %v304_v18 }
 0x120   :  { %567 = vmatmul.msk.bf16.vlgmr.msra.gmra.mxu2 %vm230_vm3, %v320_v21 }
 0x121   :  { %v269_v22 = vpop.f32.mrf.mxu1 }
 0x122   :  { %v270_v23 = vadd.f32 %v605_v15, %v269_v22 }
 0x124   :  { %v306_v26 = vmax.f32 %v270_v23, 0.0 }
 0x129   :  { %v271_v24 = vpop.f32.mrf.mxu1 }
 0x12a   :  { %v272_v25 = vadd.f32 %v605_v15, %v271_v24 }
 0x12c   :  { %v307_v27 = vmax.f32 %v272_v25, 0.0 }
 0x12e   :  { %v321_v28 = vpack.c.bf16 %v307_v27, %v306_v26 }
 0x130   :  { %568 = vmatmul.msk.bf16.gmra.mxu2 %vm230_vm3, %v321_v28 }
 0x131   :  { %v274_v29 = vpop.f32.mrf.mxu1 }
 0x132   :  { %v275_v30 = vadd.f32 %v605_v15, %v274_v29 }
 0x134   :  { %v308_v33 = vmax.f32 %v275_v30, 0.0 }
 0x139   :  { %v276_v31 = vpop.f32.mrf.mxu1 }
 0x13a   :  { %v277_v32 = vadd.f32 %v605_v15, %v276_v31 }
 0x13c   :  { %v309_v34 = vmax.f32 %v277_v32, 0.0 }
 0x13e   :  { %v322_v35 = vpack.c.bf16 %v309_v34, %v308_v33 }
 0x140   :  { %569 = vmatmul.msk.bf16.gmra.mxu2 %vm230_vm3, %v322_v35 }
 0x141   :  { %v279_v36 = vpop.f32.mrf.mxu1 }
 0x142   :  { %v280_v37 = vadd.f32 %v605_v15, %v279_v36 }
 0x144   :  { %v310_v40 = vmax.f32 %v280_v37, 0.0 }
 0x149   :  { %v281_v38 = vpop.f32.mrf.mxu1 }
 0x14a   :  { %v282_v39 = vadd.f32 %v605_v15, %v281_v38 }
 0x14c   :  { %v311_v41 = vmax.f32 %v282_v39, 0.0 }
 0x14e   :  { %v323_v42 = vpack.c.bf16 %v311_v41, %v310_v40 }
 0x150   :  { %570 = vmatmul.msk.bf16.gmra.mxu2 %vm230_vm3, %v323_v42 }
 0x151   :  { %v284_v43 = vpop.f32.mrf.mxu1 }
 0x152   :  { %v285_v44 = vadd.f32 %v605_v15, %v284_v43 }
 0x154   :  { %v312_v47 = vmax.f32 %v285_v44, 0.0 }
 0x159   :  { %v286_v45 = vpop.f32.mrf.mxu1 }
 0x15a   :  { %v287_v46 = vadd.f32 %v605_v15, %v286_v45 }
 0x15c   :  { %v313_v48 = vmax.f32 %v287_v46, 0.0 }
 0x15e   :  { %v324_v49 = vpack.c.bf16 %v313_v48, %v312_v47 }
 0x160   :  { %571 = vmatmul.msk.bf16.gmra.mxu2 %vm230_vm3, %v324_v49 }
 0x161   :  { %v289_v50 = vpop.f32.mrf.mxu1 }
 0x162   :  { %v290_v51 = vadd.f32 %v605_v15, %v289_v50 }
 0x164   :  { %v314_v54 = vmax.f32 %v290_v51, 0.0 }
 0x169   :  { %v291_v52 = vpop.f32.mrf.mxu1 }
 0x16a   :  { %v292_v53 = vadd.f32 %v605_v15, %v291_v52 }
 0x16c   :  { %v315_v55 = vmax.f32 %v292_v53, 0.0 }
 0x16e   :  { %v325_v56 = vpack.c.bf16 %v315_v55, %v314_v54 }
 0x170   :  { %572 = vmatmul.msk.bf16.gmra.mxu2 %vm230_vm3, %v325_v56 }
 0x177   :  { %v294_v57 = vpop.f32.mrf.mxu3 }
 0x178   :  { %v295_v58 = vadd.f32 %v605_v15, %v294_v57 }
 0x17a   :  { %v316_v61 = vmax.f32 %v295_v58, 0.0 }
 0x17f   :  { %v296_v59 = vpop.f32.mrf.mxu3 }
 0x180   :  { %v297_v60 = vadd.f32 %v605_v15, %v296_v59 }
 0x182   :  { %v317_v62 = vmax.f32 %v297_v60, 0.0 }
 0x184   :  { %v326_v63 = vpack.c.bf16 %v317_v62, %v316_v61 }
 0x186   :  { %573 = vmatmul.msk.bf16.vlgmr.msra.gmra.mxu3 %vm230_vm3, %v326_v63 }
 0x187   :  { %v299_v0 = vpop.f32.mrf.mxu3 }
 0x188   :  { %v300_v1 = vadd.f32 %v605_v15, %v299_v0 }
 0x18a   :  { %v318_v4 = vmax.f32 %v300_v1, 0.0 }
 0x18f   :  { %v301_v2 = vpop.f32.mrf.mxu3 }
 0x190   :  { %v302_v3 = vadd.f32 %v605_v15, %v301_v2 }
 0x192   :  { %v319_v5 = vmax.f32 %v302_v3, 0.0 }
 0x194   :  { %v327_v6 = vpack.c.bf16 %v319_v5, %v318_v4 }
 0x196   :  { %574 = vmatmul.msk.bf16.gmra.mxu3 %vm230_vm3, %v327_v6 }
 0x1a3   :  { %v397_v8 = vpop.f32.mrf.mxu2 }
 0x1a4   :  { %v398_v9 = vadd.f32 %v779_v7, %v397_v8 }
 0x1a6   :  { %v437_v10 = vmax.f32 %v398_v9, 0.0 }
 0x1a8   :  { %453 = vst [vmem:[#allocation2] sm:$0xff] %v437_v10 }
 0x1ab   :  { %v399_v11 = vpop.f32.mrf.mxu2 }
 0x1ac   :  { %v400_v12 = vadd.f32 %v779_v7, %v399_v11 }
 0x1ae   :  { %v438_v13 = vmax.f32 %v400_v12, 0.0 }
 0x1b0   :  { %454 = vst [vmem:[#allocation2 + $0x8] sm:$0xff] %v438_v13 }
 0x1b3   :  { %v402_v14 = vpop.f32.mrf.mxu2 }
 0x1b4   :  { %v403_v15 = vadd.f32 %v779_v7, %v402_v14 }
 0x1b6   :  { %v439_v16 = vmax.f32 %v403_v15, 0.0 }
 0x1b8   :  { %455 = vst [vmem:[#allocation2 + $0x10] sm:$0xff] %v439_v16 }
 0x1bb   :  { %v404_v17 = vpop.f32.mrf.mxu2 }
 0x1bc   :  { %v405_v19 = vadd.f32 %v779_v7, %v404_v17 }
 0x1be   :  { %v440_v18 = vmax.f32 %v405_v19, 0.0 }
 0x1c0   :  { %456 = vst [vmem:[#allocation2 + $0x18] sm:$0xff] %v440_v18 }
 0x1c3   :  { %v407_v20 = vpop.f32.mrf.mxu2 }
 0x1c4   :  { %v408_v21 = vadd.f32 %v779_v7, %v407_v20 }
 0x1c6   :  { %v441_v22 = vmax.f32 %v408_v21, 0.0 }
 0x1c8   :  { %457 = vst [vmem:[#allocation2 + $0x20] sm:$0xff] %v441_v22 }
 0x1cb   :  { %v409_v23 = vpop.f32.mrf.mxu2 }
 0x1cc   :  { %v410_v24 = vadd.f32 %v779_v7, %v409_v23 }
 0x1ce   :  { %v442_v25 = vmax.f32 %v410_v24, 0.0 }
 0x1d0   :  { %458 = vst [vmem:[#allocation2 + $0x28] sm:$0xff] %v442_v25 }
 0x1d3   :  { %v412_v26 = vpop.f32.mrf.mxu2 }
 0x1d4   :  { %v413_v27 = vadd.f32 %v779_v7, %v412_v26 }
 0x1d6   :  { %v443_v28 = vmax.f32 %v413_v27, 0.0 }
 0x1d8   :  { %459 = vst [vmem:[#allocation2 + $0x30] sm:$0xff] %v443_v28 }
 0x1db   :  { %v414_v29 = vpop.f32.mrf.mxu2 }
 0x1dc   :  { %v415_v30 = vadd.f32 %v779_v7, %v414_v29 }
 0x1de   :  { %v444_v31 = vmax.f32 %v415_v30, 0.0 }
 0x1e0   :  { %460 = vst [vmem:[#allocation2 + $0x38] sm:$0xff] %v444_v31 }
 0x1e3   :  { %v417_v32 = vpop.f32.mrf.mxu2 }
 0x1e4   :  { %v418_v33 = vadd.f32 %v779_v7, %v417_v32 }
 0x1e6   :  { %v445_v34 = vmax.f32 %v418_v33, 0.0 }
 0x1e8   :  { %461 = vst [vmem:[#allocation2 + $0x40] sm:$0xff] %v445_v34 }
 0x1eb   :  { %v419_v35 = vpop.f32.mrf.mxu2 }
 0x1ec   :  { %v420_v36 = vadd.f32 %v779_v7, %v419_v35 }
 0x1ee   :  { %v446_v37 = vmax.f32 %v420_v36, 0.0 }
 0x1f0   :  { %462 = vst [vmem:[#allocation2 + $0x48] sm:$0xff] %v446_v37 }
 0x1f3   :  { %v422_v38 = vpop.f32.mrf.mxu2 }
 0x1f4   :  { %v423_v39 = vadd.f32 %v779_v7, %v422_v38 }
 0x1f6   :  { %v447_v40 = vmax.f32 %v423_v39, 0.0 }
 0x1f8   :  { %463 = vst [vmem:[#allocation2 + $0x50] sm:$0xff] %v447_v40 }
 0x1fb   :  { %v424_v41 = vpop.f32.mrf.mxu2 }
 0x1fc   :  { %v425_v42 = vadd.f32 %v779_v7, %v424_v41 }
 0x1fe   :  { %v448_v43 = vmax.f32 %v425_v42, 0.0 }
 0x200   :  { %464 = vst [vmem:[#allocation2 + $0x58] sm:$0xff] %v448_v43 }
 0x209   :  { %v427_v44 = vpop.f32.mrf.mxu3 }
 0x20a   :  { %v428_v45 = vadd.f32 %v779_v7, %v427_v44 }
 0x20c   :  { %v449_v46 = vmax.f32 %v428_v45, 0.0 }
 0x20e   :  { %465 = vst [vmem:[#allocation2 + $0x60] sm:$0xff] %v449_v46 }
 0x211   :  { %v429_v47 = vpop.f32.mrf.mxu3 }
 0x212   :  { %v430_v48 = vadd.f32 %v779_v7, %v429_v47 }
 0x214   :  { %v450_v49 = vmax.f32 %v430_v48, 0.0 }
 0x216   :  { %466 = vst [vmem:[#allocation2 + $0x68] sm:$0xff] %v450_v49 }
 0x219   :  { %v432_v50 = vpop.f32.mrf.mxu3 }
 0x21a   :  { %v433_v51 = vadd.f32 %v779_v7, %v432_v50 }
 0x21c   :  { %v451_v52 = vmax.f32 %v433_v51, 0.0 }
 0x21e   :  { %467 = vst [vmem:[#allocation2 + $0x70] sm:$0xff] %v451_v52 }
 0x221   :  { %v434_v53 = vpop.f32.mrf.mxu3 }
 0x222   :  { %v435_v54 = vadd.f32 %v779_v7, %v434_v53 }
 0x224   :  { %v452_v55 = vmax.f32 %v435_v54, 0.0 }
 0x226   :  { %468 = vst [vmem:[#allocation2 + $0x78] sm:$0xff] %v452_v55 }
 0x227   :  { %481 = dma.vmem_to_hbm [thread:$0]  %s474_s11, 2048, %s476_s14, [#allocation3], %s635_s15, %s635_s15, %s636_s16  }
 0x228   :  { %631 = dma.done.wait [#allocation3], 2048  }
 0x229   :  { %632 = vsyncadd [#allocation3], 4294965248 }
 0x22a   :  { %486 = vsyncpa [#allocation3], 1 }

</bundles_post_ra>
